<compile_context>
chip_gen: v6e
topology: v6e:2x2x1
jax: 0.10.0
libtpu: 0.0.40
codegen_flags: <defaults>
</compile_context>

<pallas_src>
import functools

import jax
import jax.numpy as jnp
from jax.experimental import pallas as pl
from jax.experimental.pallas import tpu as pltpu


def _round_up(x, m):
    return ((x + m - 1) // m) * m


def _actor_kernel(x_ref, w1_ref, b1_ref, w2_ref, b2_ref, w3_ref, b3_ref,
                  o_ref, *, max_action):
    # x / w* are bf16 (full-rate MXU); accumulate + nonlinearities in f32.
    x = x_ref[...]
    h1 = jnp.dot(x, w1_ref[...], preferred_element_type=jnp.float32) + b1_ref[...]
    h1 = jnp.maximum(h1, 0.0).astype(jnp.bfloat16)
    h2 = jnp.dot(h1, w2_ref[...], preferred_element_type=jnp.float32) + b2_ref[...]
    h2 = jnp.maximum(h2, 0.0).astype(jnp.bfloat16)
    a = jnp.dot(h2, w3_ref[...], preferred_element_type=jnp.float32) + b3_ref[...]
    o_ref[...] = (jnp.tanh(a) * max_action).astype(o_ref.dtype)


def _pad2d(x, rows, cols):
    return jnp.pad(x, ((0, rows - x.shape[0]), (0, cols - x.shape[1])))


def actor_forward(state, params, max_action, *, batch_block=128):
    """state: (B, state_dim) float32. Returns (B, action_dim) float32."""
    w1, b1, w2, b2, w3, b3 = params
    B, state_dim = state.shape
    h1_dim, h2_dim = w1.shape[1], w2.shape[1]
    action_dim = w3.shape[1]

    # Lane / MXU friendly padded dims (256-multiples for hidden dims so the
    # v6e/v7x 256x256 MXU gets clean passes; 128 is enough for the edges).
    sp = _round_up(state_dim, 128)      # 17  -> 128
    h1p = _round_up(h1_dim, 256)        # 400 -> 512
    h2p = _round_up(h2_dim, 256)        # 300 -> 512
    ap = _round_up(action_dim, 128)     # 6   -> 128

    # Batch tiling: small batches become one sublane-aligned block; large
    # batches are tiled by `batch_block` rows and pipelined over the grid.
    if B <= batch_block:
        bm = _round_up(B, 8)
        bp = bm
    else:
        bm = batch_block
        bp = _round_up(B, bm)

    # One-time operand prep: zero-pad, cast matmul operands to bf16.
    x_p = _pad2d(state, bp, sp).astype(jnp.bfloat16)
    w1_p = _pad2d(w1, sp, h1p).astype(jnp.bfloat16)
    w2_p = _pad2d(w2, h1p, h2p).astype(jnp.bfloat16)
    w3_p = _pad2d(w3, h2p, ap).astype(jnp.bfloat16)
    b1_p = _pad2d(b1, 1, h1p)   # biases stay f32 (added post-accumulation)
    b2_p = _pad2d(b2, 1, h2p)
    b3_p = _pad2d(b3, 1, ap)

    kernel = functools.partial(_actor_kernel, max_action=float(max_action))

    out_padded = pl.pallas_call(
        kernel,
        out_shape=jax.ShapeDtypeStruct((bp, ap), jnp.float32),
        grid=(bp // bm,),
        in_specs=[
            pl.BlockSpec((bm, sp), lambda i: (i, 0)),     # state: tiled over batch
            pl.BlockSpec((sp, h1p), lambda i: (0, 0)),    # weights pinned in VMEM
            pl.BlockSpec((1, h1p), lambda i: (0, 0)),
            pl.BlockSpec((h1p, h2p), lambda i: (0, 0)),
            pl.BlockSpec((1, h2p), lambda i: (0, 0)),
            pl.BlockSpec((h2p, ap), lambda i: (0, 0)),
            pl.BlockSpec((1, ap), lambda i: (0, 0)),
        ],
        out_specs=pl.BlockSpec((bm, ap), lambda i: (i, 0)),
        compiler_params=pltpu.CompilerParams(
            dimension_semantics=("parallel",),
            vmem_limit_bytes=8 << 20,
        ),
    )(x_p, w1_p, b1_p, w2_p, b2_p, w3_p, b3_p)

    return out_padded[:B, :action_dim]


def init_actor_params(key, state_dim, action_dim):
    """Deterministic init mimicking torch.nn.Linear default: U(-1/sqrt(fan_in), 1/sqrt(fan_in))."""
    dims = [(state_dim, 400), (400, 300), (300, action_dim)]
    params = []
    for (fan_in, fan_out) in dims:
        key, kw, kb = jax.random.split(key, 3)
        bound = 1.0 / jnp.sqrt(jnp.float32(fan_in))
        w = jax.random.uniform(kw, (fan_in, fan_out), jnp.float32, -bound, bound)
        b = jax.random.uniform(kb, (1, fan_out), jnp.float32, -bound, bound)
        params += [w, b]
    return tuple(params)


def actor_reference(state, params, max_action):
    w1, b1, w2, b2, w3, b3 = params
    h1 = jax.nn.relu(state @ w1 + b1)
    h2 = jax.nn.relu(h1 @ w2 + b2)
    return jnp.tanh(h2 @ w3 + b3) * max_action


if __name__ == "__main__":
    key = jax.random.PRNGKey(0)
    k_params, k_state = jax.random.split(key)

    # Small, forward-consistent shapes: batch=2, state_dim=17, action_dim=6.
    B, state_dim, action_dim = 2, 17, 6
    max_action = 2.0

    params = init_actor_params(k_params, state_dim, action_dim)
    state = jax.random.normal(k_state, (B, state_dim), jnp.float32)

    out = actor_forward(state, params, max_action)
    out = jax.block_until_ready(out)

    ref = actor_reference(state, params, max_action)
    assert out.shape == (B, action_dim)
    # bf16 matmul inputs with f32 accumulation: relaxed tolerance vs f32 reference.
    assert jnp.allclose(out, ref, atol=5e-2, rtol=5e-2), "mismatch vs JAX reference"

    print("KERNEL_OK")
</pallas_src>

<mosaic_0001>
module attributes {stable_mosaic.version = 11 : i64} {
  func.func @_actor_kernel(%arg0: i32, %arg1: memref<8x128xbf16, #tpu.memory_space<vmem>>, %arg2: memref<128x512xbf16, #tpu.memory_space<vmem>>, %arg3: memref<1x512xf32, #tpu.memory_space<vmem>>, %arg4: memref<512x512xbf16, #tpu.memory_space<vmem>>, %arg5: memref<1x512xf32, #tpu.memory_space<vmem>>, %arg6: memref<512x128xbf16, #tpu.memory_space<vmem>>, %arg7: memref<1x128xf32, #tpu.memory_space<vmem>>, %arg8: memref<8x128xf32, #tpu.memory_space<vmem>>) attributes {dimension_semantics = [#tpu.dimension_semantics<parallel>], iteration_bounds = array<i64: 1>, scalar_prefetch = 0 : i64, scratch_operands = 0 : i64, tpu.core_type = #tpu.core_type<tc>, window_params = [{transform_indices = @transform_0, window_bounds = array<i64: 8, 128>}, {pipeline_mode = #tpu.pipeline_mode<synchronous>, transform_indices = @transform_1, window_bounds = array<i64: 128, 512>}, {pipeline_mode = #tpu.pipeline_mode<synchronous>, transform_indices = @transform_2, window_bounds = array<i64: 1, 512>}, {pipeline_mode = #tpu.pipeline_mode<synchronous>, transform_indices = @transform_3, window_bounds = array<i64: 512, 512>}, {pipeline_mode = #tpu.pipeline_mode<synchronous>, transform_indices = @transform_4, window_bounds = array<i64: 1, 512>}, {pipeline_mode = #tpu.pipeline_mode<synchronous>, transform_indices = @transform_5, window_bounds = array<i64: 512, 128>}, {pipeline_mode = #tpu.pipeline_mode<synchronous>, transform_indices = @transform_6, window_bounds = array<i64: 1, 128>}, {transform_indices = @transform_7, window_bounds = array<i64: 8, 128>}]} {
    %c0 = arith.constant 0 : index
    %c0_0 = arith.constant 0 : index
    %0 = vector.load %arg1[%c0, %c0_0] : memref<8x128xbf16, #tpu.memory_space<vmem>>, vector<8x128xbf16>
    %c0_1 = arith.constant 0 : index
    %c0_2 = arith.constant 0 : index
    %1 = vector.load %arg2[%c0_1, %c0_2] : memref<128x512xbf16, #tpu.memory_space<vmem>>, vector<128x512xbf16>
    %cst = arith.constant dense<0.000000e+00> : vector<8x512xf32>
    %2 = tpu.matmul %0, %1, %cst {dimension_numbers = #tpu.dot_dimension_numbers<[1], [0], [0], [1], [0, 0, 1, 1], [], []>} : vector<8x128xbf16>, vector<128x512xbf16>, vector<8x512xf32> -> vector<8x512xf32>
    %c0_3 = arith.constant 0 : index
    %c0_4 = arith.constant 0 : index
    %3 = vector.load %arg3[%c0_3, %c0_4] : memref<1x512xf32, #tpu.memory_space<vmem>>, vector<1x512xf32>
    %4 = vector.broadcast %3 : vector<1x512xf32> to vector<8x512xf32>
    %5 = arith.addf %2, %4 : vector<8x512xf32>
    %cst_5 = arith.constant 0.000000e+00 : f32
    %6 = vector.broadcast %cst_5 : f32 to vector<8x512xf32>
    %7 = arith.maximumf %5, %6 : vector<8x512xf32>
    %8 = arith.truncf %7 : vector<8x512xf32> to vector<8x512xbf16>
    %c0_6 = arith.constant 0 : index
    %c0_7 = arith.constant 0 : index
    %9 = vector.load %arg4[%c0_6, %c0_7] : memref<512x512xbf16, #tpu.memory_space<vmem>>, vector<512x512xbf16>
    %cst_8 = arith.constant dense<0.000000e+00> : vector<8x512xf32>
    %10 = tpu.matmul %8, %9, %cst_8 {dimension_numbers = #tpu.dot_dimension_numbers<[1], [0], [0], [1], [0, 0, 1, 1], [], []>} : vector<8x512xbf16>, vector<512x512xbf16>, vector<8x512xf32> -> vector<8x512xf32>
    %c0_9 = arith.constant 0 : index
    %c0_10 = arith.constant 0 : index
    %11 = vector.load %arg5[%c0_9, %c0_10] : memref<1x512xf32, #tpu.memory_space<vmem>>, vector<1x512xf32>
    %12 = vector.broadcast %11 : vector<1x512xf32> to vector<8x512xf32>
    %13 = arith.addf %10, %12 : vector<8x512xf32>
    %cst_11 = arith.constant 0.000000e+00 : f32
    %14 = vector.broadcast %cst_11 : f32 to vector<8x512xf32>
    %15 = arith.maximumf %13, %14 : vector<8x512xf32>
    %16 = arith.truncf %15 : vector<8x512xf32> to vector<8x512xbf16>
    %c0_12 = arith.constant 0 : index
    %c0_13 = arith.constant 0 : index
    %17 = vector.load %arg6[%c0_12, %c0_13] : memref<512x128xbf16, #tpu.memory_space<vmem>>, vector<512x128xbf16>
    %cst_14 = arith.constant dense<0.000000e+00> : vector<8x128xf32>
    %18 = tpu.matmul %16, %17, %cst_14 {dimension_numbers = #tpu.dot_dimension_numbers<[1], [0], [0], [1], [0, 0, 1, 1], [], []>} : vector<8x512xbf16>, vector<512x128xbf16>, vector<8x128xf32> -> vector<8x128xf32>
    %c0_15 = arith.constant 0 : index
    %c0_16 = arith.constant 0 : index
    %19 = vector.load %arg7[%c0_15, %c0_16] : memref<1x128xf32, #tpu.memory_space<vmem>>, vector<1x128xf32>
    %20 = vector.broadcast %19 : vector<1x128xf32> to vector<8x128xf32>
    %21 = arith.addf %18, %20 : vector<8x128xf32>
    %22 = math.tanh %21 : vector<8x128xf32>
    %cst_17 = arith.constant 2.000000e+00 : f32
    %23 = vector.broadcast %cst_17 : f32 to vector<8x128xf32>
    %24 = arith.mulf %22, %23 : vector<8x128xf32>
    %c0_18 = arith.constant 0 : index
    %c0_19 = arith.constant 0 : index
    %25 = vector.load %arg8[%c0_18, %c0_19] : memref<8x128xf32, #tpu.memory_space<vmem>>, vector<8x128xf32>
    tpu.vector_store %arg8[%c0_18, %c0_19], %24 {strides = array<i32>} : memref<8x128xf32, #tpu.memory_space<vmem>>, vector<8x128xf32>,
    return
  }
  func.func @transform_0(%arg0: i32) -> (i32, i32) {
    %c0_i32 = arith.constant 0 : i32
    %c0_i32_0 = arith.constant 0 : i32
    return %arg0, %c0_i32 : i32, i32
  }
  func.func @transform_1(%arg0: i32) -> (i32, i32) {
    %c0_i32 = arith.constant 0 : i32
    %c0_i32_0 = arith.constant 0 : i32
    %c0_i32_1 = arith.constant 0 : i32
    return %c0_i32, %c0_i32_0 : i32, i32
  }
  func.func @transform_2(%arg0: i32) -> (i32, i32) {
    %c0_i32 = arith.constant 0 : i32
    %c0_i32_0 = arith.constant 0 : i32
    %c0_i32_1 = arith.constant 0 : i32
    return %c0_i32, %c0_i32_0 : i32, i32
  }
  func.func @transform_3(%arg0: i32) -> (i32, i32) {
    %c0_i32 = arith.constant 0 : i32
    %c0_i32_0 = arith.constant 0 : i32
    %c0_i32_1 = arith.constant 0 : i32
    return %c0_i32, %c0_i32_0 : i32, i32
  }
  func.func @transform_4(%arg0: i32) -> (i32, i32) {
    %c0_i32 = arith.constant 0 : i32
    %c0_i32_0 = arith.constant 0 : i32
    %c0_i32_1 = arith.constant 0 : i32
    return %c0_i32, %c0_i32_0 : i32, i32
  }
  func.func @transform_5(%arg0: i32) -> (i32, i32) {
    %c0_i32 = arith.constant 0 : i32
    %c0_i32_0 = arith.constant 0 : i32
    %c0_i32_1 = arith.constant 0 : i32
    return %c0_i32, %c0_i32_0 : i32, i32
  }
  func.func @transform_6(%arg0: i32) -> (i32, i32) {
    %c0_i32 = arith.constant 0 : i32
    %c0_i32_0 = arith.constant 0 : i32
    %c0_i32_1 = arith.constant 0 : i32
    return %c0_i32, %c0_i32_0 : i32, i32
  }
  func.func @transform_7(%arg0: i32) -> (i32, i32) {
    %c0_i32 = arith.constant 0 : i32
    %c0_i32_0 = arith.constant 0 : i32
    return %arg0, %c0_i32 : i32, i32
  }
}

</mosaic_0001>

<bundles_post_ra>
// kernel: tpu_custom_call.1
= control target key start
LH: loop header
LB: loop body
LE: loop exit
PB: predicated region body
PF: predicated region fallthrough
CT: control target
= control target key end

     0   :  { %12 = vsyncpa [#allocation3], 0  ;;  %s2477_s0 = inlined_call_operand.hbm [shape: bf16[8,128], index: 0, kind: input, shape index: {}]   ;;  %s2478_s1 = inlined_call_operand.hbm [shape: bf16[128,512], index: 1, kind: input, shape index: {}]   ;;  %s2479_s2 = inlined_call_operand.hbm [shape: f32[1,512], index: 2, kind: input, shape index: {}]   ;;  %s2480_s3 = inlined_call_operand.hbm [shape: bf16[512,512], index: 3, kind: input, shape index: {}]   ;;  %s2481_s4 = inlined_call_operand.vmem [shape: f32[1,512], index: 4, kind: input, shape index: {}]   ;;  %s2482_s5 = inlined_call_operand.hbm [shape: bf16[512,128], index: 5, kind: input, shape index: {}]   ;;  %s2483_s6 = inlined_call_operand.vmem [shape: f32[1,128], index: 6, kind: input, shape index: {}]   ;;  %s2484_s7 = inlined_call_operand.hbm [shape: f32[8,128], index: 7, kind: output, shape index: {}]  }
   0x1   :  { %13 = vsyncpa [#allocation6], 0 }
   0x2   :  { %14 = vsyncpa [#allocation9], 0 }
   0x3   :  { %15 = vsyncpa [#allocation4], 0  ;;  %s2372_s24 = smov [#allocation5]  }
   0x4   :  { %s31_s25 = sshll.u32 %s2372_s24, 4  ;;  %s32_s25 = int_to_ptr.vmem [resolvable:$true] %s31_s25 }
   0x5   :  { %s2252_s26 = scalar_lea.vmem %s32_s25, 4096  ;;  %p2257_p1 = scmp.lt.s32.totalorder %s32_s25, %s32_s25 }
   0x6   :  { %p2253_p0 = scmp.ne.s32.totalorder %s32_s25, %s2252_s26  ;;  %p2258_p2 = scmp.lt.s32.totalorder %s2252_s26, %s2252_s26 }
   0x8   :  { %p2259_p3 = por %p2258_p2, %p2257_p1 }
   0xa   :  { %p2260_p4 = pnand %p2259_p3, %p2253_p0 }
   0xc   :  { %2263 = shalt.err (!%p2260_p4)
}
   0xd   :  { %s2373_s27 = smov 256   ;;  %s2374_s28 = smov 16  }
   0xe   :  { %37 = dma.hbm_to_vmem [thread:$0]  %s2478_s1, 4096, %s32_s25, [#allocation6], %s2373_s27, %s2373_s27, %s2374_s28  }
   0xf   :  { %s2375_s8 = smov [#allocation8]   ;;  %s2376_s10 = smov [#allocation2]  }
  0x10   :  { %s53_s9 = sshll.u32 %s2375_s8, 4  ;;  %s22_s11 = sshll.u32 %s2376_s10, 4  ;;  %s54_s9 = int_to_ptr.vmem [resolvable:$true] %s53_s9  ;;  %s23_s11 = int_to_ptr.vmem [resolvable:$true] %s22_s11 }
  0x11   :  { %s2272_s12 = scalar_lea.vmem %s54_s9, 16384  ;;  %p2277_p6 = scmp.lt.s32.totalorder %s54_s9, %s54_s9 }
  0x12   :  { %p2273_p5 = scmp.ne.s32.totalorder %s54_s9, %s2272_s12  ;;  %p2278_p7 = scmp.lt.s32.totalorder %s2272_s12, %s2272_s12 }
  0x14   :  { %p2279_p8 = por %p2278_p7, %p2277_p6 }
  0x16   :  { %p2280_p9 = pnand %p2279_p8, %p2273_p5 }
  0x18   :  { %2283 = shalt.err (!%p2280_p9)
}
  0x19   :  { %59 = dma.hbm_to_vmem [thread:$0]  %s2480_s3, 16384, %s54_s9, [#allocation9], %s2373_s27, %s2373_s27, %s2374_s28  }
  0x1a   :  { %s2292_s15 = scalar_lea.vmem %s23_s11, 64  ;;  %p2297_p11 = scmp.lt.s32.totalorder %s23_s11, %s23_s11 }
  0x1b   :  { %p2293_p10 = scmp.ne.s32.totalorder %s23_s11, %s2292_s15  ;;  %p2298_p12 = scmp.lt.s32.totalorder %s2292_s15, %s2292_s15 }
  0x1d   :  { %p2299_p13 = por %p2298_p12, %p2297_p11 }
  0x1f   :  { %p2300_p0 = pnand %p2299_p13, %p2293_p10 }
  0x21   :  { %2303 = shalt.err (!%p2300_p0)
}
  0x22   :  { %25 = dma.hbm_to_vmem [thread:$0]  %s2477_s0, 64, %s23_s11, [#allocation3]  }
  0x23   :  { %s2377_s17 = smov [#allocation7]   ;;  %s2378_s19 = smov [#allocation10]  }
  0x24   :  { %s44_s18 = sshll.u32 %s2377_s17, 4  ;;  %s67_s20 = sshll.u32 %s2378_s19, 4  ;;  %s45_s18 = int_to_ptr.vmem [resolvable:$true] %s44_s18  ;;  %s68_s20 = int_to_ptr.vmem [resolvable:$true] %s67_s20 }
  0x25   :  { %s2312_s21 = scalar_lea.vmem %s45_s18, 64  ;;  %p2317_p2 = scmp.lt.s32.totalorder %s45_s18, %s45_s18 }
  0x26   :  { %p2313_p1 = scmp.ne.s32.totalorder %s45_s18, %s2312_s21  ;;  %p2318_p3 = scmp.lt.s32.totalorder %s2312_s21, %s2312_s21 }
  0x28   :  { %p2319_p4 = por %p2318_p3, %p2317_p2 }
  0x2a   :  { %p2320_p5 = pnand %p2319_p4, %p2313_p1 }
  0x2c   :  { %2323 = shalt.err (!%p2320_p5)
}
  0x2d   :  { %47 = dma.hbm_to_vmem [thread:$0]  %s2479_s2, 64, %s45_s18, [#allocation6]  }
  0x2e   :  { %s2332_s23 = scalar_lea.vmem %s68_s20, 4096  ;;  %p2337_p7 = scmp.lt.s32.totalorder %s68_s20, %s68_s20 }
  0x2f   :  { %p2333_p6 = scmp.ne.s32.totalorder %s68_s20, %s2332_s23  ;;  %p2338_p8 = scmp.lt.s32.totalorder %s2332_s23, %s2332_s23 }
  0x31   :  { %p2339_p9 = por %p2338_p8, %p2337_p7 }
  0x33   :  { %p2340_p10 = pnand %p2339_p9, %p2333_p6 }
  0x35   :  { %2343 = shalt.err (!%p2340_p10)
}
  0x36   :  { %s2379_s0 = smov 64   ;;  %s2380_s24 = smov 4  }
  0x37   :  { %73 = dma.hbm_to_vmem [thread:$0]  %s2482_s5, 4096, %s68_s20, [#allocation9], %s2379_s0, %s2379_s0, %s2380_s24  }
  0x38   :  { %2364 = dma.done.wait [#allocation3], 64  }
  0x39   :  { %2365 = vsyncadd [#allocation3], 4294967232 }
  0x3a   :  { %2366 = dma.done.wait [#allocation6], 4160  }
  0x3b   :  { %2367 = vsyncadd [#allocation6], 4294963136 }
  0x3c   :  { %2368 = dma.done.wait [#allocation9], 20480  }
  0x3d   :  { %2369 = vsyncadd [#allocation9], 4294946816  ;;  %v2381_v0 = vmov 0   ;;  %v1970_v1 = vld [vmem:[#allocation5 + $0xe4] ss:$16 sps:$4 sm:$0xff]   ;;  %s2382_s28 = smov [#allocation11]  }
  0x3e   :  { %339 = vmatprep.mubr.bf16.mxu0 %v2381_v0  ;;  %380 = vmatprep.mubr.bf16.mxu1 %v2381_v0  ;;  %v1972_v2 = vld [vmem:[#allocation5 + $0xec] ss:$16 sps:$4 sm:$0xff]   ;;  %v1974_v3 = vld [vmem:[#allocation5 + $0xe0] ss:$16 sps:$4 sm:$0xff]   ;;  %v1975_v4 = vld [vmem:[#allocation5 + $0xe8] ss:$16 sps:$4 sm:$0xff]  }
  0x3f   :  { %307 = vmatprep.subr.bf16.mxu0 %v1970_v1  ;;  %348 = vmatprep.subr.bf16.mxu1 %v1972_v2  ;;  %v1976_v5 = vld [vmem:[#allocation5 + $0xc4] ss:$16 sps:$4 sm:$0xff]   ;;  %v1978_v6 = vld [vmem:[#allocation5 + $0xcc] ss:$16 sps:$4 sm:$0xff]   ;;  %v1980_v7 = vld [vmem:[#allocation5 + $0xc0] ss:$16 sps:$4 sm:$0xff]  }
  0x40   :  { %308 = vmatpush1.bf16.msra.mxu0 %v1974_v3  ;;  %349 = vmatpush1.bf16.msra.mxu1 %v1975_v4  ;;  %v1981_v8 = vld [vmem:[#allocation5 + $0xc8] ss:$16 sps:$4 sm:$0xff]   ;;  %v1982_v9 = vld [vmem:[#allocation5 + $0xa4] ss:$16 sps:$4 sm:$0xff]   ;;  %v1984_v10 = vld [vmem:[#allocation5 + $0xac] ss:$16 sps:$4 sm:$0xff]  }
  0x41   :  { %309 = vmatprep.subr.bf16.mxu0 %v1976_v5  ;;  %350 = vmatprep.subr.bf16.mxu1 %v1978_v6  ;;  %v1986_v11 = vld [vmem:[#allocation5 + $0xa0] ss:$16 sps:$4 sm:$0xff]   ;;  %v1987_v12 = vld [vmem:[#allocation5 + $0xa8] ss:$16 sps:$4 sm:$0xff]   ;;  %v1988_v13 = vld [vmem:[#allocation5 + $0x84] ss:$16 sps:$4 sm:$0xff]  }
  0x42   :  { %v1990_v14 = vld [vmem:[#allocation5 + $0x8c] ss:$16 sps:$4 sm:$0xff]   ;;  %v1992_v15 = vld [vmem:[#allocation5 + $0x80] ss:$16 sps:$4 sm:$0xff]   ;;  %v1993_v16 = vld [vmem:[#allocation5 + $0x88] ss:$16 sps:$4 sm:$0xff]  }
  0x43   :  { %v1994_v17 = vld [vmem:[#allocation5 + $0x64] ss:$16 sps:$4 sm:$0xff]   ;;  %v1996_v18 = vld [vmem:[#allocation5 + $0x6c] ss:$16 sps:$4 sm:$0xff]   ;;  %v1998_v19 = vld [vmem:[#allocation5 + $0x60] ss:$16 sps:$4 sm:$0xff]  }
  0x44   :  { %310 = vmatpush1.bf16.msra.mxu0 %v1980_v7  ;;  %351 = vmatpush1.bf16.msra.mxu1 %v1981_v8  ;;  %v1999_v20 = vld [vmem:[#allocation5 + $0x68] ss:$16 sps:$4 sm:$0xff]   ;;  %v2000_v21 = vld [vmem:[#allocation5 + $0x44] ss:$16 sps:$4 sm:$0xff]   ;;  %v2002_v22 = vld [vmem:[#allocation5 + $0x4c] ss:$16 sps:$4 sm:$0xff]  }
  0x45   :  { %311 = vmatprep.subr.bf16.mxu0 %v1982_v9  ;;  %352 = vmatprep.subr.bf16.mxu1 %v1984_v10  ;;  %v2004_v23 = vld [vmem:[#allocation5 + $0x40] ss:$16 sps:$4 sm:$0xff]   ;;  %v2005_v24 = vld [vmem:[#allocation5 + $0x48] ss:$16 sps:$4 sm:$0xff]   ;;  %v2006_v25 = vld [vmem:[#allocation5 + $0x24] ss:$16 sps:$4 sm:$0xff]  }
  0x46   :  { %v2008_v26 = vld [vmem:[#allocation5 + $0x2c] ss:$16 sps:$4 sm:$0xff]   ;;  %v2010_v27 = vld [vmem:[#allocation5 + $0x20] ss:$16 sps:$4 sm:$0xff]   ;;  %v2011_v28 = vld [vmem:[#allocation5 + $0x28] ss:$16 sps:$4 sm:$0xff]  }
  0x47   :  { %v2012_v29 = vld [vmem:[#allocation5 + $0x4] ss:$16 sps:$4 sm:$0xff]   ;;  %v2014_v30 = vld [vmem:[#allocation5 + $0xc] ss:$16 sps:$4 sm:$0xff]   ;;  %v2016_v31 = vld [vmem:[#allocation5] ss:$16 sps:$4 sm:$0xff]  }
  0x48   :  { %312 = vmatpush1.bf16.msra.mxu0 %v1986_v11  ;;  %353 = vmatpush1.bf16.msra.mxu1 %v1987_v12  ;;  %v2017_v32 = vld [vmem:[#allocation5 + $0x8] ss:$16 sps:$4 sm:$0xff]   ;;  %v92_v35 = vld [vmem:[#allocation2] sm:$0xf]  ;;  %v2018_v36 = vld [vmem:[#allocation8 + $0xe0] ss:$16 sps:$4 sm:$0xff]  }
  0x49   :  { %313 = vmatprep.subr.bf16.mxu0 %v1988_v13  ;;  %354 = vmatprep.subr.bf16.mxu1 %v1990_v14  ;;  %v2020_v33 = vld [vmem:[#allocation8 + $0xe4] ss:$16 sps:$4 sm:$0xff]   ;;  %v2021_v37 = vld [vmem:[#allocation8 + $0x2e0] ss:$16 sps:$4 sm:$0xff]   ;;  %s1711_s29 = sshll.u32 %s2382_s28, 4  ;;  %s1712_s29 = int_to_ptr.vmem [resolvable:$true] %s1711_s29 }
  0x4a   :  { %v2023_v34 = vld [vmem:[#allocation8 + $0x2e4] ss:$16 sps:$4 sm:$0xff]   ;;  %v2024_v40 = vld [vmem:[#allocation8 + $0xc0] ss:$16 sps:$4 sm:$0xff]   ;;  %s2344_s30 = scalar_lea.vmem %s1712_s29, 128  ;;  %p2349_p12 = scmp.lt.s32.totalorder %s1712_s29, %s1712_s29 }
  0x4b   :  { %v2026_v38 = vld [vmem:[#allocation8 + $0xc4] ss:$16 sps:$4 sm:$0xff]   ;;  %v2027_v41 = vld [vmem:[#allocation8 + $0x2c0] ss:$16 sps:$4 sm:$0xff]   ;;  %p2345_p11 = scmp.ne.s32.totalorder %s1712_s29, %s2344_s30  ;;  %p2350_p13 = scmp.lt.s32.totalorder %s2344_s30, %s2344_s30 }
  0x4c   :  { %314 = vmatpush1.bf16.msra.mxu0 %v1992_v15  ;;  %355 = vmatpush1.bf16.msra.mxu1 %v1993_v16  ;;  %v2029_v39 = vld [vmem:[#allocation8 + $0x2c4] ss:$16 sps:$4 sm:$0xff]   ;;  %v2030_v44 = vld [vmem:[#allocation8 + $0xa0] ss:$16 sps:$4 sm:$0xff]  }
  0x4d   :  { %315 = vmatprep.subr.bf16.mxu0 %v1994_v17  ;;  %356 = vmatprep.subr.bf16.mxu1 %v1996_v18  ;;  %v2032_v42 = vld [vmem:[#allocation8 + $0xa4] ss:$16 sps:$4 sm:$0xff]   ;;  %v2033_v45 = vld [vmem:[#allocation8 + $0x2a0] ss:$16 sps:$4 sm:$0xff]   ;;  %p2351_p0 = por %p2350_p13, %p2349_p12 }
  0x4e   :  { %v2035_v43 = vld [vmem:[#allocation8 + $0x2a4] ss:$16 sps:$4 sm:$0xff]   ;;  %v2036_v48 = vld [vmem:[#allocation8 + $0x80] ss:$16 sps:$4 sm:$0xff]  }
  0x4f   :  { %v2038_v46 = vld [vmem:[#allocation8 + $0x84] ss:$16 sps:$4 sm:$0xff]   ;;  %v2039_v49 = vld [vmem:[#allocation8 + $0x280] ss:$16 sps:$4 sm:$0xff]   ;;  %p2352_p1 = pnand %p2351_p0, %p2345_p11 }
  0x50   :  { %316 = vmatpush1.bf16.msra.mxu0 %v1998_v19  ;;  %357 = vmatpush1.bf16.msra.mxu1 %v1999_v20  ;;  %v2041_v47 = vld [vmem:[#allocation8 + $0x284] ss:$16 sps:$4 sm:$0xff]   ;;  %v2042_v52 = vld [vmem:[#allocation8 + $0x60] ss:$16 sps:$4 sm:$0xff]  }
  0x51   :  { %317 = vmatprep.subr.bf16.mxu0 %v2000_v21  ;;  %358 = vmatprep.subr.bf16.mxu1 %v2002_v22  ;;  %v2044_v50 = vld [vmem:[#allocation8 + $0x64] ss:$16 sps:$4 sm:$0xff]   ;;  %v2045_v53 = vld [vmem:[#allocation8 + $0x260] ss:$16 sps:$4 sm:$0xff]  }
  0x52   :  { %v2047_v51 = vld [vmem:[#allocation8 + $0x264] ss:$16 sps:$4 sm:$0xff]   ;;  %v2048_v56 = vld [vmem:[#allocation8 + $0x40] ss:$16 sps:$4 sm:$0xff]  }
  0x53   :  { %v2050_v54 = vld [vmem:[#allocation8 + $0x44] ss:$16 sps:$4 sm:$0xff]   ;;  %v2051_v57 = vld [vmem:[#allocation8 + $0x240] ss:$16 sps:$4 sm:$0xff]  }
  0x54   :  { %318 = vmatpush1.bf16.msra.mxu0 %v2004_v23  ;;  %359 = vmatpush1.bf16.msra.mxu1 %v2005_v24  ;;  %v2053_v55 = vld [vmem:[#allocation8 + $0x244] ss:$16 sps:$4 sm:$0xff]   ;;  %v2054_v60 = vld [vmem:[#allocation8 + $0x20] ss:$16 sps:$4 sm:$0xff]  }
  0x55   :  { %319 = vmatprep.subr.bf16.mxu0 %v2006_v25  ;;  %360 = vmatprep.subr.bf16.mxu1 %v2008_v26  ;;  %v2056_v58 = vld [vmem:[#allocation8 + $0x24] ss:$16 sps:$4 sm:$0xff]   ;;  %v2057_v61 = vld [vmem:[#allocation8 + $0x220] ss:$16 sps:$4 sm:$0xff]  }
  0x56   :  { %v2059_v59 = vld [vmem:[#allocation8 + $0x224] ss:$16 sps:$4 sm:$0xff]   ;;  %v2060_v0 = vld [vmem:[#allocation8] ss:$16 sps:$4 sm:$0xff]  }
  0x57   :  { %v2062_v62 = vld [vmem:[#allocation8 + $0x4] ss:$16 sps:$4 sm:$0xff]   ;;  %v2063_v1 = vld [vmem:[#allocation8 + $0x200] ss:$16 sps:$4 sm:$0xff]  }
  0x58   :  { %320 = vmatpush1.bf16.msra.mxu0 %v2010_v27  ;;  %361 = vmatpush1.bf16.msra.mxu1 %v2011_v28  ;;  %v2065_v63 = vld [vmem:[#allocation8 + $0x204] ss:$16 sps:$4 sm:$0xff]   ;;  %v2066_v4 = vld [vmem:[#allocation8 + $0x1e0] ss:$16 sps:$4 sm:$0xff]  }
  0x59   :  { %321 = vmatprep.subr.bf16.mxu0 %v2012_v29  ;;  %362 = vmatprep.subr.bf16.mxu1 %v2014_v30  ;;  %v2068_v2 = vld [vmem:[#allocation8 + $0x1e4] ss:$16 sps:$4 sm:$0xff]   ;;  %v2069_v5 = vld [vmem:[#allocation8 + $0x3e0] ss:$16 sps:$4 sm:$0xff]  }
  0x5a   :  { %v2071_v3 = vld [vmem:[#allocation8 + $0x3e4] ss:$16 sps:$4 sm:$0xff]   ;;  %v2072_v8 = vld [vmem:[#allocation8 + $0x1c0] ss:$16 sps:$4 sm:$0xff]  }
  0x5b   :  { %v2074_v6 = vld [vmem:[#allocation8 + $0x1c4] ss:$16 sps:$4 sm:$0xff]   ;;  %v2075_v9 = vld [vmem:[#allocation8 + $0x3c0] ss:$16 sps:$4 sm:$0xff]  }
  0x5c   :  { %322 = vmatpush1.bf16.msra.mxu0 %v2016_v31  ;;  %363 = vmatpush1.bf16.msra.mxu1 %v2017_v32  ;;  %v2077_v7 = vld [vmem:[#allocation8 + $0x3c4] ss:$16 sps:$4 sm:$0xff]   ;;  %v2078_v12 = vld [vmem:[#allocation8 + $0x1a0] ss:$16 sps:$4 sm:$0xff]  }
  0x5d   :  { %1187 = vmatprep.subr.bf16.mxu0 %v2020_v33  ;;  %1228 = vmatprep.subr.bf16.mxu1 %v2023_v34  ;;  %v2080_v10 = vld [vmem:[#allocation8 + $0x1a4] ss:$16 sps:$4 sm:$0xff]   ;;  %v2081_v13 = vld [vmem:[#allocation8 + $0x3a0] ss:$16 sps:$4 sm:$0xff]   ;;  %v2116_v34 = vld [vmem:[#allocation8 + $0xec] ss:$16 sps:$4 sm:$0xff]  }
  0x5e   :  { %v2083_v11 = vld [vmem:[#allocation8 + $0x3a4] ss:$16 sps:$4 sm:$0xff]   ;;  %v2084_v16 = vld [vmem:[#allocation8 + $0x180] ss:$16 sps:$4 sm:$0xff]  }
  0x5f   :  { %340 = vmatmul.mubr.bf16.vlgmr.msra.gmra.mxu0 %v92_v35  ;;  %381 = vmatmul.mubr.bf16.vlgmr.msra.gmra.mxu1 %v92_v35  ;;  %v2086_v14 = vld [vmem:[#allocation8 + $0x184] ss:$16 sps:$4 sm:$0xff]   ;;  %v2087_v17 = vld [vmem:[#allocation8 + $0x380] ss:$16 sps:$4 sm:$0xff]   ;;  %v2119_v35 = vld [vmem:[#allocation8 + $0x2ec] ss:$16 sps:$4 sm:$0xff]  }
  0x60   :  { %1188 = vmatpush1.bf16.msra.mxu0 %v2018_v36  ;;  %1229 = vmatpush1.bf16.msra.mxu1 %v2021_v37  ;;  %v2089_v15 = vld [vmem:[#allocation8 + $0x384] ss:$16 sps:$4 sm:$0xff]   ;;  %v2090_v20 = vld [vmem:[#allocation8 + $0x160] ss:$16 sps:$4 sm:$0xff]   ;;  %v127_v36 = vlaneseq }
  0x61   :  { %1189 = vmatprep.subr.bf16.mxu0 %v2026_v38  ;;  %1230 = vmatprep.subr.bf16.mxu1 %v2029_v39  ;;  %v2092_v18 = vld [vmem:[#allocation8 + $0x164] ss:$16 sps:$4 sm:$0xff]   ;;  %v2093_v21 = vld [vmem:[#allocation8 + $0x360] ss:$16 sps:$4 sm:$0xff]  }
  0x62   :  { %v2095_v19 = vld [vmem:[#allocation8 + $0x364] ss:$16 sps:$4 sm:$0xff]   ;;  %v2096_v24 = vld [vmem:[#allocation8 + $0x140] ss:$16 sps:$4 sm:$0xff]   ;;  %v2438_v37 = vshrl.u32 %v127_v36, 7 }
  0x63   :  { %v2098_v22 = vld [vmem:[#allocation8 + $0x144] ss:$16 sps:$4 sm:$0xff]   ;;  %v2099_v25 = vld [vmem:[#allocation8 + $0x340] ss:$16 sps:$4 sm:$0xff]   ;;  %v2165_v36 = vld [vmem:[#allocation8 + $0x3e8] ss:$16 sps:$4 sm:$0xff]  }
  0x64   :  { %1190 = vmatpush1.bf16.msra.mxu0 %v2024_v40  ;;  %1231 = vmatpush1.bf16.msra.mxu1 %v2027_v41  ;;  %v2101_v23 = vld [vmem:[#allocation8 + $0x344] ss:$16 sps:$4 sm:$0xff]   ;;  %v2102_v28 = vld [vmem:[#allocation8 + $0x120] ss:$16 sps:$4 sm:$0xff]   ;;  %v129_v38 = vsub.s32 0, %v2438_v37  ;;  %v137_v39 = vsub.s32 2, %v2438_v37 }
  0x65   :  { %1191 = vmatprep.subr.bf16.mxu0 %v2032_v42  ;;  %1232 = vmatprep.subr.bf16.mxu1 %v2035_v43  ;;  %v2104_v26 = vld [vmem:[#allocation8 + $0x124] ss:$16 sps:$4 sm:$0xff]   ;;  %v2105_v29 = vld [vmem:[#allocation8 + $0x320] ss:$16 sps:$4 sm:$0xff]   ;;  %v125_v40 = vld [vmem:[#allocation7] sm:$0xf] }
  0x66   :  { %v2107_v27 = vld [vmem:[#allocation8 + $0x324] ss:$16 sps:$4 sm:$0xff]   ;;  %v2108_v32 = vld [vmem:[#allocation8 + $0x100] ss:$16 sps:$4 sm:$0xff]   ;;  %v133_v41 = vsub.s32 1, %v2438_v37  ;;  %v141_v42 = vsub.s32 3, %v2438_v37  ;;  %v130_v43 = vrot.slane %v125_v40, %v129_v38 }
  0x67   :  { %v2110_v30 = vld [vmem:[#allocation8 + $0x104] ss:$16 sps:$4 sm:$0xff]   ;;  %v2111_v33 = vld [vmem:[#allocation8 + $0x300] ss:$16 sps:$4 sm:$0xff]  }
  0x68   :  { %1192 = vmatpush1.bf16.msra.mxu0 %v2030_v44  ;;  %1233 = vmatpush1.bf16.msra.mxu1 %v2033_v45  ;;  %v2113_v31 = vld [vmem:[#allocation8 + $0x304] ss:$16 sps:$4 sm:$0xff]   ;;  %v138_v44 = vrot.slane %v125_v40, %v137_v39  ;;  %v134_v45 = vrot.slane %v125_v40, %v133_v41 }
  0x69   :  { %1193 = vmatprep.subr.bf16.mxu0 %v2038_v46  ;;  %1234 = vmatprep.subr.bf16.mxu1 %v2041_v47  ;;  %v142_v46 = vrot.slane %v125_v40, %v141_v42  ;;  %v2170_v40 = vld [vmem:[#allocation8 + $0x1cc] ss:$16 sps:$4 sm:$0xff]  }
  0x6c   :  { %1194 = vmatpush1.bf16.msra.mxu0 %v2036_v48  ;;  %1235 = vmatpush1.bf16.msra.mxu1 %v2039_v49 }
  0x6d   :  { %1195 = vmatprep.subr.bf16.mxu0 %v2044_v50  ;;  %1236 = vmatprep.subr.bf16.mxu1 %v2047_v51 }
  0x70   :  { %1196 = vmatpush1.bf16.msra.mxu0 %v2042_v52  ;;  %1237 = vmatpush1.bf16.msra.mxu1 %v2045_v53 }
  0x71   :  { %1197 = vmatprep.subr.bf16.mxu0 %v2050_v54  ;;  %1238 = vmatprep.subr.bf16.mxu1 %v2053_v55 }
  0x74   :  { %1198 = vmatpush1.bf16.msra.mxu0 %v2048_v56  ;;  %1239 = vmatpush1.bf16.msra.mxu1 %v2051_v57 }
  0x75   :  { %1199 = vmatprep.subr.bf16.mxu0 %v2056_v58  ;;  %1240 = vmatprep.subr.bf16.mxu1 %v2059_v59 }
  0x78   :  { %1200 = vmatpush1.bf16.msra.mxu0 %v2054_v60  ;;  %1241 = vmatpush1.bf16.msra.mxu1 %v2057_v61 }
  0x79   :  { %1201 = vmatprep.subr.bf16.mxu0 %v2062_v62  ;;  %1242 = vmatprep.subr.bf16.mxu1 %v2065_v63 }
  0x7c   :  { %1202 = vmatpush1.bf16.msra.mxu0 %v2060_v0  ;;  %1243 = vmatpush1.bf16.msra.mxu1 %v2063_v1 }
  0x7d   :  { %1203 = vmatprep.subr.bf16.mxu0 %v2068_v2  ;;  %1244 = vmatprep.subr.bf16.mxu1 %v2071_v3  ;;  %v2114_v2 = vld [vmem:[#allocation8 + $0xe8] ss:$16 sps:$4 sm:$0xff]  }
  0x7e   :  { %v2117_v3 = vld [vmem:[#allocation8 + $0x2e8] ss:$16 sps:$4 sm:$0xff]  }
  0x80   :  { %1204 = vmatpush2.bf16.msra.mxu0 %v2066_v4  ;;  %1245 = vmatpush2.bf16.msra.mxu1 %v2069_v5  ;;  %v2122_v5 = vld [vmem:[#allocation8 + $0xcc] ss:$16 sps:$4 sm:$0xff]  }
  0x81   :  { %1205 = vmatprep.subr.bf16.mxu0 %v2074_v6  ;;  %1246 = vmatprep.subr.bf16.mxu1 %v2077_v7  ;;  %v2125_v6 = vld [vmem:[#allocation8 + $0x2cc] ss:$16 sps:$4 sm:$0xff]   ;;  %v2120_v7 = vld [vmem:[#allocation8 + $0xc8] ss:$16 sps:$4 sm:$0xff]  }
  0x84   :  { %1206 = vmatpush2.bf16.msra.mxu0 %v2072_v8  ;;  %1247 = vmatpush2.bf16.msra.mxu1 %v2075_v9  ;;  %v2123_v8 = vld [vmem:[#allocation8 + $0x2c8] ss:$16 sps:$4 sm:$0xff]   ;;  %v2128_v9 = vld [vmem:[#allocation8 + $0xac] ss:$16 sps:$4 sm:$0xff]  }
  0x85   :  { %1207 = vmatprep.subr.bf16.mxu0 %v2080_v10  ;;  %1248 = vmatprep.subr.bf16.mxu1 %v2083_v11  ;;  %v2131_v10 = vld [vmem:[#allocation8 + $0x2ac] ss:$16 sps:$4 sm:$0xff]   ;;  %v2126_v11 = vld [vmem:[#allocation8 + $0xa8] ss:$16 sps:$4 sm:$0xff]  }
  0x88   :  { %1208 = vmatpush2.bf16.msra.mxu0 %v2078_v12  ;;  %1249 = vmatpush2.bf16.msra.mxu1 %v2081_v13  ;;  %v2129_v12 = vld [vmem:[#allocation8 + $0x2a8] ss:$16 sps:$4 sm:$0xff]   ;;  %v2134_v13 = vld [vmem:[#allocation8 + $0x8c] ss:$16 sps:$4 sm:$0xff]  }
  0x89   :  { %1209 = vmatprep.subr.bf16.mxu0 %v2086_v14  ;;  %1250 = vmatprep.subr.bf16.mxu1 %v2089_v15  ;;  %v2137_v14 = vld [vmem:[#allocation8 + $0x28c] ss:$16 sps:$4 sm:$0xff]   ;;  %v2132_v15 = vld [vmem:[#allocation8 + $0x88] ss:$16 sps:$4 sm:$0xff]  }
  0x8c   :  { %1210 = vmatpush2.bf16.msra.mxu0 %v2084_v16  ;;  %1251 = vmatpush2.bf16.msra.mxu1 %v2087_v17  ;;  %v2135_v16 = vld [vmem:[#allocation8 + $0x288] ss:$16 sps:$4 sm:$0xff]   ;;  %v2140_v17 = vld [vmem:[#allocation8 + $0x6c] ss:$16 sps:$4 sm:$0xff]  }
  0x8d   :  { %1211 = vmatprep.subr.bf16.mxu0 %v2092_v18  ;;  %1252 = vmatprep.subr.bf16.mxu1 %v2095_v19  ;;  %v2143_v18 = vld [vmem:[#allocation8 + $0x26c] ss:$16 sps:$4 sm:$0xff]   ;;  %v2138_v19 = vld [vmem:[#allocation8 + $0x68] ss:$16 sps:$4 sm:$0xff]  }
  0x90   :  { %1212 = vmatpush2.bf16.msra.mxu0 %v2090_v20  ;;  %1253 = vmatpush2.bf16.msra.mxu1 %v2093_v21  ;;  %v2141_v20 = vld [vmem:[#allocation8 + $0x268] ss:$16 sps:$4 sm:$0xff]   ;;  %v2146_v21 = vld [vmem:[#allocation8 + $0x4c] ss:$16 sps:$4 sm:$0xff]  }
  0x91   :  { %1213 = vmatprep.subr.bf16.mxu0 %v2098_v22  ;;  %1254 = vmatprep.subr.bf16.mxu1 %v2101_v23  ;;  %v2149_v22 = vld [vmem:[#allocation8 + $0x24c] ss:$16 sps:$4 sm:$0xff]   ;;  %v2144_v23 = vld [vmem:[#allocation8 + $0x48] ss:$16 sps:$4 sm:$0xff]  }
  0x94   :  { %1214 = vmatpush2.bf16.msra.mxu0 %v2096_v24  ;;  %1255 = vmatpush2.bf16.msra.mxu1 %v2099_v25  ;;  %v2147_v24 = vld [vmem:[#allocation8 + $0x248] ss:$16 sps:$4 sm:$0xff]   ;;  %v2152_v25 = vld [vmem:[#allocation8 + $0x2c] ss:$16 sps:$4 sm:$0xff]  }
  0x95   :  { %1215 = vmatprep.subr.bf16.mxu0 %v2104_v26  ;;  %1256 = vmatprep.subr.bf16.mxu1 %v2107_v27  ;;  %v2155_v26 = vld [vmem:[#allocation8 + $0x22c] ss:$16 sps:$4 sm:$0xff]   ;;  %v2150_v27 = vld [vmem:[#allocation8 + $0x28] ss:$16 sps:$4 sm:$0xff]  }
  0x98   :  { %1216 = vmatpush2.bf16.msra.mxu0 %v2102_v28  ;;  %1257 = vmatpush2.bf16.msra.mxu1 %v2105_v29  ;;  %v2153_v28 = vld [vmem:[#allocation8 + $0x228] ss:$16 sps:$4 sm:$0xff]   ;;  %v2158_v29 = vld [vmem:[#allocation8 + $0xc] ss:$16 sps:$4 sm:$0xff]  }
  0x99   :  { %1217 = vmatprep.subr.bf16.mxu0 %v2110_v30  ;;  %1258 = vmatprep.subr.bf16.mxu1 %v2113_v31  ;;  %v2161_v30 = vld [vmem:[#allocation8 + $0x20c] ss:$16 sps:$4 sm:$0xff]   ;;  %v2156_v31 = vld [vmem:[#allocation8 + $0x8] ss:$16 sps:$4 sm:$0xff]  }
  0x9c   :  { %1218 = vmatpush2.bf16.msra.mxu0 %v2108_v32  ;;  %1259 = vmatpush2.bf16.msra.mxu1 %v2111_v33  ;;  %v2159_v32 = vld [vmem:[#allocation8 + $0x208] ss:$16 sps:$4 sm:$0xff]   ;;  %v2164_v33 = vld [vmem:[#allocation8 + $0x1ec] ss:$16 sps:$4 sm:$0xff]  }
  0x9d   :  { %1269 = vmatprep.subr.bf16.mxu0 %v2116_v34  ;;  %1310 = vmatprep.subr.bf16.mxu1 %v2119_v35  ;;  %v2167_v34 = vld [vmem:[#allocation8 + $0x3ec] ss:$16 sps:$4 sm:$0xff]   ;;  %v2162_v35 = vld [vmem:[#allocation8 + $0x1e8] ss:$16 sps:$4 sm:$0xff]  }
 0x11f   :  { %v341_v47 = vpop.f32.mrf.mxu0  ;;  %v382_v48 = vpop.f32.mrf.mxu1 }
 0x120   :  { %v342_v49 = vadd.f32 %v341_v47, %v130_v43  ;;  %v383_v50 = vadd.f32 %v382_v48, %v138_v44  ;;  %v2173_v43 = vld [vmem:[#allocation8 + $0x3cc] ss:$16 sps:$4 sm:$0xff]   ;;  %v2168_v44 = vld [vmem:[#allocation8 + $0x1c8] ss:$16 sps:$4 sm:$0xff]  }
 0x121   :  { %v343_v51 = vpop.f32.mrf.mxu0  ;;  %v384_v52 = vpop.f32.mrf.mxu1  ;;  %v2179_v47 = vld [vmem:[#allocation8 + $0x3ac] ss:$16 sps:$4 sm:$0xff]   ;;  %v2174_v48 = vld [vmem:[#allocation8 + $0x1a8] ss:$16 sps:$4 sm:$0xff]  }
 0x122   :  { %v391_v53 = vmax.f32 %v383_v50, 0.0  ;;  %v344_v54 = vadd.f32 %v343_v51, %v134_v45  ;;  %v385_v55 = vadd.f32 %v384_v52, %v142_v46  ;;  %v389_v56 = vmax.f32 %v342_v49, 0.0  ;;  %v2171_v45 = vld [vmem:[#allocation8 + $0x3c8] ss:$16 sps:$4 sm:$0xff]   ;;  %v2176_v46 = vld [vmem:[#allocation8 + $0x1ac] ss:$16 sps:$4 sm:$0xff]  }
 0x123   :  { %v345_v57 = vpop.f32.mrf.mxu0  ;;  %v386_v58 = vpop.f32.mrf.mxu1  ;;  %v2177_v49 = vld [vmem:[#allocation8 + $0x3a8] ss:$16 sps:$4 sm:$0xff]   ;;  %v2182_v50 = vld [vmem:[#allocation8 + $0x18c] ss:$16 sps:$4 sm:$0xff]  }
 0x124   :  { %v390_v59 = vmax.f32 %v344_v54, 0.0  ;;  %v392_v60 = vmax.f32 %v385_v55, 0.0  ;;  %v2452_v61 = vpack.c.bf16 %v391_v53, %v391_v53  ;;  %v2454_v4 = vpack.c.bf16 %v389_v56, %v389_v56  ;;  %v2185_v51 = vld [vmem:[#allocation8 + $0x38c] ss:$16 sps:$4 sm:$0xff]   ;;  %v2180_v52 = vld [vmem:[#allocation8 + $0x188] ss:$16 sps:$4 sm:$0xff]  }
 0x125   :  { %v346_v62 = vpop.f32.mrf.mxu0  ;;  %v387_v63 = vpop.f32.mrf.mxu1  ;;  %v2183_v53 = vld [vmem:[#allocation8 + $0x388] ss:$16 sps:$4 sm:$0xff]   ;;  %v2188_v54 = vld [vmem:[#allocation8 + $0x16c] ss:$16 sps:$4 sm:$0xff]  }
 0x126   :  { %v394_v0 = vpack.c.bf16 %v390_v59, %v390_v59  ;;  %v396_v1 = vpack.c.bf16 %v392_v60, %v392_v60  ;;  %v2191_v55 = vld [vmem:[#allocation8 + $0x36c] ss:$16 sps:$4 sm:$0xff]   ;;  %v2186_v56 = vld [vmem:[#allocation8 + $0x168] ss:$16 sps:$4 sm:$0xff]  }
 0x127   :  { %v2189_v57 = vld [vmem:[#allocation8 + $0x368] ss:$16 sps:$4 sm:$0xff]   ;;  %v2194_v58 = vld [vmem:[#allocation8 + $0x14c] ss:$16 sps:$4 sm:$0xff]  }
 0x128   :  { %1219 = vmatprep.mubr.bf16.mxu0 %v394_v0  ;;  %1260 = vmatprep.mubr.bf16.mxu1 %v396_v1  ;;  %v2197_v59 = vld [vmem:[#allocation8 + $0x34c] ss:$16 sps:$4 sm:$0xff]   ;;  %v2192_v60 = vld [vmem:[#allocation8 + $0x148] ss:$16 sps:$4 sm:$0xff]  }
 0x129   :  { %1220 = vmatmul.mubr.bf16.vlgmr.msra.gmra.mxu0 %v2454_v4  ;;  %1261 = vmatmul.mubr.bf16.vlgmr.msra.gmra.mxu1 %v2452_v61  ;;  %v2195_v62 = vld [vmem:[#allocation8 + $0x348] ss:$16 sps:$4 sm:$0xff]   ;;  %v2200_v63 = vld [vmem:[#allocation8 + $0x12c] ss:$16 sps:$4 sm:$0xff]  }
 0x12a   :  { %1270 = vmatpush1.bf16.msra.mxu0 %v2114_v2  ;;  %1311 = vmatpush1.bf16.msra.mxu1 %v2117_v3  ;;  %v2201_v2 = vld [vmem:[#allocation8 + $0x328] ss:$16 sps:$4 sm:$0xff]   ;;  %v2206_v3 = vld [vmem:[#allocation8 + $0x10c] ss:$16 sps:$4 sm:$0xff]  }
 0x12b   :  { %1301 = vmatprep.mubr.bf16.mxu0 %v394_v0  ;;  %1342 = vmatprep.mubr.bf16.mxu1 %v396_v1  ;;  %v2203_v0 = vld [vmem:[#allocation8 + $0x32c] ss:$16 sps:$4 sm:$0xff]   ;;  %v2198_v1 = vld [vmem:[#allocation8 + $0x128] ss:$16 sps:$4 sm:$0xff]  }
 0x12c   :  { %1271 = vmatprep.subr.bf16.mxu0 %v2122_v5  ;;  %1312 = vmatprep.subr.bf16.mxu1 %v2125_v6  ;;  %v2209_v5 = vld [vmem:[#allocation8 + $0x30c] ss:$16 sps:$4 sm:$0xff]   ;;  %v2204_v6 = vld [vmem:[#allocation8 + $0x108] ss:$16 sps:$4 sm:$0xff]  }
 0x12e   :  { %1272 = vmatpush1.bf16.msra.mxu0 %v2120_v7  ;;  %1313 = vmatpush1.bf16.msra.mxu1 %v2123_v8  ;;  %v2207_v7 = vld [vmem:[#allocation8 + $0x308] ss:$16 sps:$4 sm:$0xff]  }
 0x12f   :  { %1273 = vmatprep.subr.bf16.mxu0 %v2128_v9  ;;  %1314 = vmatprep.subr.bf16.mxu1 %v2131_v10  ;;  %v2210_v8 = vld [vmem:[#allocation10 + $0x78] sm:$0xff]   ;;  %v2212_v10 = vld [vmem:[#allocation10 + $0x70] sm:$0xff]  }
 0x130   :  { %v2211_v9 = vld [vmem:[#allocation10 + $0x38] sm:$0xff]  }
 0x132   :  { %1274 = vmatpush1.bf16.msra.mxu0 %v2126_v11  ;;  %1315 = vmatpush1.bf16.msra.mxu1 %v2129_v12  ;;  %v2213_v11 = vld [vmem:[#allocation10 + $0x30] sm:$0xff]   ;;  %v2214_v12 = vld [vmem:[#allocation10 + $0x68] sm:$0xff]  }
 0x133   :  { %1275 = vmatprep.subr.bf16.mxu0 %v2134_v13  ;;  %1316 = vmatprep.subr.bf16.mxu1 %v2137_v14  ;;  %v2215_v13 = vld [vmem:[#allocation10 + $0x28] sm:$0xff]   ;;  %v2216_v14 = vld [vmem:[#allocation10 + $0x60] sm:$0xff]  }
 0x136   :  { %1276 = vmatpush1.bf16.msra.mxu0 %v2132_v15  ;;  %1317 = vmatpush1.bf16.msra.mxu1 %v2135_v16  ;;  %v2217_v15 = vld [vmem:[#allocation10 + $0x20] sm:$0xff]   ;;  %v2218_v16 = vld [vmem:[#allocation10 + $0x58] sm:$0xff]  }
 0x137   :  { %1277 = vmatprep.subr.bf16.mxu0 %v2140_v17  ;;  %1318 = vmatprep.subr.bf16.mxu1 %v2143_v18  ;;  %v2226_v17 = vld [vmem:[#allocation10 + $0xf8] sm:$0xff]  }
 0x138   :  { %v2227_v18 = vld [vmem:[#allocation10 + $0xb8] sm:$0xff]  }
 0x13a   :  { %1278 = vmatpush1.bf16.msra.mxu0 %v2138_v19  ;;  %1319 = vmatpush1.bf16.msra.mxu1 %v2141_v20  ;;  %v2228_v19 = vld [vmem:[#allocation10 + $0xf0] sm:$0xff]   ;;  %v2219_v20 = vld [vmem:[#allocation10 + $0x18] sm:$0xff]  }
 0x13b   :  { %1279 = vmatprep.subr.bf16.mxu0 %v2146_v21  ;;  %1320 = vmatprep.subr.bf16.mxu1 %v2149_v22  ;;  %v2230_v21 = vld [vmem:[#allocation10 + $0xe8] sm:$0xff]   ;;  %v2221_v22 = vld [vmem:[#allocation10 + $0x10] sm:$0xff]  }
 0x13e   :  { %1280 = vmatpush1.bf16.msra.mxu0 %v2144_v23  ;;  %1321 = vmatpush1.bf16.msra.mxu1 %v2147_v24  ;;  %v2222_v23 = vld [vmem:[#allocation10 + $0x48] sm:$0xff]  }
 0x13f   :  { %1281 = vmatprep.subr.bf16.mxu0 %v2152_v25  ;;  %1322 = vmatprep.subr.bf16.mxu1 %v2155_v26  ;;  %v2231_v24 = vld [vmem:[#allocation10 + $0xa8] sm:$0xff]   ;;  %v2232_v25 = vld [vmem:[#allocation10 + $0xe0] sm:$0xff]  }
 0x140   :  { %v2223_v26 = vld [vmem:[#allocation10 + $0x8] sm:$0xff]  }
 0x142   :  { %1282 = vmatpush1.bf16.msra.mxu0 %v2150_v27  ;;  %1323 = vmatpush1.bf16.msra.mxu1 %v2153_v28  ;;  %v2224_v27 = vld [vmem:[#allocation10 + $0x40] sm:$0xff]  }
 0x143   :  { %1283 = vmatprep.subr.bf16.mxu0 %v2158_v29  ;;  %1324 = vmatprep.subr.bf16.mxu1 %v2161_v30  ;;  %v2233_v28 = vld [vmem:[#allocation10 + $0xa0] sm:$0xff]   ;;  %v2234_v29 = vld [vmem:[#allocation10 + $0xd8] sm:$0xff]  }
 0x144   :  { %v2225_v30 = vld [vmem:[#allocation10] sm:$0xff]  }
 0x146   :  { %1284 = vmatpush1.bf16.msra.mxu0 %v2156_v31  ;;  %1325 = vmatpush1.bf16.msra.mxu1 %v2159_v32  ;;  %v2235_v31 = vld [vmem:[#allocation10 + $0x98] sm:$0xff]   ;;  %v2236_v32 = vld [vmem:[#allocation10 + $0xd0] sm:$0xff]  }
 0x147   :  { %1285 = vmatprep.subr.bf16.mxu0 %v2164_v33  ;;  %1326 = vmatprep.subr.bf16.mxu1 %v2167_v34  ;;  %v2237_v33 = vld [vmem:[#allocation10 + $0x90] sm:$0xff]   ;;  %v2238_v34 = vld [vmem:[#allocation10 + $0xc8] sm:$0xff]  }
 0x14a   :  { %1286 = vmatpush2.bf16.msra.mxu0 %v2162_v35  ;;  %1327 = vmatpush2.bf16.msra.mxu1 %v2165_v36  ;;  %v2239_v35 = vld [vmem:[#allocation10 + $0x88] sm:$0xff]   ;;  %v2240_v36 = vld [vmem:[#allocation10 + $0xc0] sm:$0xff]  }
 0x14b   :  { %1287 = vmatprep.subr.bf16.mxu0 %v2170_v40  ;;  %1328 = vmatprep.subr.bf16.mxu1 %v2173_v43  ;;  %v2241_v40 = vld [vmem:[#allocation10 + $0x80] sm:$0xff]   ;;  %v525_v43 = vld [vmem:[%s2481_s4] sm:$0xf] }
 0x14e   :  { %1288 = vmatpush2.bf16.msra.mxu0 %v2168_v44  ;;  %1329 = vmatpush2.bf16.msra.mxu1 %v2171_v45  ;;  %v530_v44 = vrot.slane %v525_v43, %v129_v38  ;;  %v534_v45 = vrot.slane %v525_v43, %v133_v41  ;;  %v538_v38 = vrot.slane %v525_v43, %v137_v39 }
 0x14f   :  { %1289 = vmatprep.subr.bf16.mxu0 %v2176_v46  ;;  %1330 = vmatprep.subr.bf16.mxu1 %v2179_v47  ;;  %v542_v41 = vrot.slane %v525_v43, %v141_v42 }
 0x152   :  { %1290 = vmatpush2.bf16.msra.mxu0 %v2174_v48  ;;  %1331 = vmatpush2.bf16.msra.mxu1 %v2177_v49 }
 0x153   :  { %1291 = vmatprep.subr.bf16.mxu0 %v2182_v50  ;;  %1332 = vmatprep.subr.bf16.mxu1 %v2185_v51 }
 0x156   :  { %1292 = vmatpush2.bf16.msra.mxu0 %v2180_v52  ;;  %1333 = vmatpush2.bf16.msra.mxu1 %v2183_v53 }
 0x157   :  { %1293 = vmatprep.subr.bf16.mxu0 %v2188_v54  ;;  %1334 = vmatprep.subr.bf16.mxu1 %v2191_v55 }
 0x15a   :  { %1294 = vmatpush2.bf16.msra.mxu0 %v2186_v56  ;;  %1335 = vmatpush2.bf16.msra.mxu1 %v2189_v57 }
 0x15b   :  { %1295 = vmatprep.subr.bf16.mxu0 %v2194_v58  ;;  %1336 = vmatprep.subr.bf16.mxu1 %v2197_v59 }
 0x15e   :  { %1296 = vmatpush2.bf16.msra.mxu0 %v2192_v60  ;;  %1337 = vmatpush2.bf16.msra.mxu1 %v2195_v62 }
 0x15f   :  { %1297 = vmatprep.subr.bf16.mxu0 %v2200_v63  ;;  %1338 = vmatprep.subr.bf16.mxu1 %v2203_v0 }
 0x162   :  { %1298 = vmatpush2.bf16.msra.mxu0 %v2198_v1  ;;  %1339 = vmatpush2.bf16.msra.mxu1 %v2201_v2 }
 0x163   :  { %1299 = vmatprep.subr.bf16.mxu0 %v2206_v3  ;;  %1340 = vmatprep.subr.bf16.mxu1 %v2209_v5 }
 0x166   :  { %1300 = vmatpush2.bf16.msra.mxu0 %v2204_v6  ;;  %1341 = vmatpush2.bf16.msra.mxu1 %v2207_v7 }
 0x167   :  { %1915 = vmatprep.subr.bf16.mxu0 %v2210_v8  ;;  %1937 = vmatprep.subr.bf16.mxu1 %v2226_v17 }
 0x169   :  { %1302 = vmatmul.mubr.bf16.vlgmr.msra.gmra.mxu0 %v2454_v4  ;;  %1343 = vmatmul.mubr.bf16.vlgmr.msra.gmra.mxu1 %v2452_v61  ;;  %v2220_v4 = vld [vmem:[#allocation10 + $0x50] sm:$0xff]  }
 0x16a   :  { %1916 = vmatpush3.bf16.msra.mxu0 %v2211_v9  ;;  %1938 = vmatpush3.bf16.msra.mxu1 %v2227_v18  ;;  %v2229_v61 = vld [vmem:[#allocation10 + $0xb0] sm:$0xff]   ;;  %v1882_v18 = vld [vmem:[%s2483_s6] ss:$0 sm:$0xff] }
 0x16b   :  { %1917 = vmatprep.subr.bf16.mxu0 %v2212_v10  ;;  %1939 = vmatprep.subr.bf16.mxu1 %v2228_v19 }
 0x16e   :  { %1918 = vmatpush3.bf16.msra.mxu0 %v2213_v11  ;;  %1940 = vmatpush3.bf16.msra.mxu1 %v2229_v61 }
 0x16f   :  { %1919 = vmatprep.subr.bf16.mxu0 %v2214_v12  ;;  %1941 = vmatprep.subr.bf16.mxu1 %v2230_v21 }
 0x172   :  { %1920 = vmatpush3.bf16.msra.mxu0 %v2215_v13  ;;  %1942 = vmatpush3.bf16.msra.mxu1 %v2231_v24 }
 0x173   :  { %1921 = vmatprep.subr.bf16.mxu0 %v2216_v14  ;;  %1943 = vmatprep.subr.bf16.mxu1 %v2232_v25 }
 0x176   :  { %1922 = vmatpush3.bf16.msra.mxu0 %v2217_v15  ;;  %1944 = vmatpush3.bf16.msra.mxu1 %v2233_v28 }
 0x177   :  { %1923 = vmatprep.subr.bf16.mxu0 %v2218_v16  ;;  %1945 = vmatprep.subr.bf16.mxu1 %v2234_v29 }
 0x17a   :  { %1924 = vmatpush3.bf16.msra.mxu0 %v2219_v20  ;;  %1946 = vmatpush3.bf16.msra.mxu1 %v2235_v31 }
 0x17b   :  { %1925 = vmatprep.subr.bf16.mxu0 %v2220_v4  ;;  %1947 = vmatprep.subr.bf16.mxu1 %v2236_v32 }
 0x17e   :  { %1926 = vmatpush3.bf16.msra.mxu0 %v2221_v22  ;;  %1948 = vmatpush3.bf16.msra.mxu1 %v2237_v33 }
 0x17f   :  { %1927 = vmatprep.subr.bf16.mxu0 %v2222_v23  ;;  %1949 = vmatprep.subr.bf16.mxu1 %v2238_v34 }
 0x182   :  { %1928 = vmatpush3.bf16.msra.mxu0 %v2223_v26  ;;  %1950 = vmatpush3.bf16.msra.mxu1 %v2239_v35 }
 0x183   :  { %1929 = vmatprep.subr.bf16.mxu0 %v2224_v27  ;;  %1951 = vmatprep.subr.bf16.mxu1 %v2240_v36 }
 0x186   :  { %1930 = vmatpush3.bf16.msra.mxu0 %v2225_v30  ;;  %1952 = vmatpush3.bf16.msra.mxu1 %v2241_v40 }
 0x1e9   :  { %v1221_v46 = vpop.f32.mrf.mxu0  ;;  %v1262_v47 = vpop.f32.mrf.mxu1 }
 0x1ea   :  { %v1222_v48 = vadd.f32 %v1221_v46, %v530_v44 }
 0x1eb   :  { %v1223_v49 = vpop.f32.mrf.mxu0  ;;  %v1264_v50 = vpop.f32.mrf.mxu1 }
 0x1ec   :  { %v1263_v51 = vadd.f32 %v1262_v47, %v1222_v48  ;;  %v1224_v52 = vadd.f32 %v1223_v49, %v534_v45 }
 0x1ed   :  { %v1225_v53 = vpop.f32.mrf.mxu0  ;;  %v1266_v54 = vpop.f32.mrf.mxu1 }
 0x1ee   :  { %v1265_v55 = vadd.f32 %v1264_v50, %v1224_v52  ;;  %v1351_v56 = vmax.f32 %v1263_v51, 0.0 }
 0x1ef   :  { %v1226_v57 = vpop.f32.mrf.mxu0  ;;  %v1267_v58 = vpop.f32.mrf.mxu1 }
 0x1f0   :  { %v1352_v59 = vmax.f32 %v1265_v55, 0.0  ;;  %v1355_v62 = vpack.c.bf16 %v1351_v56, %v1351_v56 }
 0x1f2   :  { %v1356_v60 = vpack.c.bf16 %v1352_v59, %v1352_v59 }
 0x1f4   :  { %1654 = vmatprep.mubr.bf16.mxu0 %v1356_v60 }
 0x1f5   :  { %1655 = vmatmul.mubr.bf16.vlgmr.msra.gmra.mxu0 %v1355_v62 }
 0x229   :  { %v1303_v63 = vpop.f32.mrf.mxu0  ;;  %v1344_v0 = vpop.f32.mrf.mxu1 }
 0x22a   :  { %v1304_v1 = vadd.f32 %v1303_v63, %v538_v38 }
 0x22b   :  { %v1305_v2 = vpop.f32.mrf.mxu0  ;;  %v1346_v3 = vpop.f32.mrf.mxu1 }
 0x22c   :  { %v1345_v5 = vadd.f32 %v1344_v0, %v1304_v1  ;;  %v1306_v6 = vadd.f32 %v1305_v2, %v542_v41 }
 0x22d   :  { %v1307_v7 = vpop.f32.mrf.mxu0  ;;  %v1348_v8 = vpop.f32.mrf.mxu1 }
 0x22e   :  { %v1347_v9 = vadd.f32 %v1346_v3, %v1306_v6  ;;  %v1353_v10 = vmax.f32 %v1345_v5, 0.0 }
 0x22f   :  { %v1308_v11 = vpop.f32.mrf.mxu0  ;;  %v1349_v12 = vpop.f32.mrf.mxu1 }
 0x230   :  { %v1354_v13 = vmax.f32 %v1347_v9, 0.0  ;;  %v1357_v15 = vpack.c.bf16 %v1353_v10, %v1353_v10 }
 0x232   :  { %v1358_v14 = vpack.c.bf16 %v1354_v13, %v1354_v13 }
 0x234   :  { %1694 = vmatprep.mubr.bf16.mxu1 %v1358_v14 }
 0x235   :  { %1695 = vmatmul.mubr.bf16.vlgmr.msra.gmra.mxu1 %v1357_v15 }
 0x2b5   :  { %v1931_v37 = vpop.f32.mrf.mxu0 }
 0x2b7   :  { %v1932_v39 = vpop.f32.mrf.mxu0 }
 0x2b8   :  { %v1933_v17 = vadd.f32 %v1932_v39, %v1931_v37 }
 0x2b9   :  { %v1934_v42 = vpop.f32.mrf.mxu0 }
 0x2ba   :  { %v1657_v4 = vadd.f32 %v1933_v17, %v1882_v18 }
 0x2bb   :  { %v1935_v16 = vpop.f32.mrf.mxu0 }
 0x2f5   :  { %v1953_v19 = vpop.f32.mrf.mxu1 }
 0x2f7   :  { %v1954_v20 = vpop.f32.mrf.mxu1 }
 0x2f8   :  { %v1955_v61 = vadd.f32 %v1954_v20, %v1953_v19 }
 0x2f9   :  { %v1956_v21 = vpop.f32.mrf.mxu1 }
 0x2fa   :  { %v1697_v22 = vadd.f32 %v1955_v61, %v1657_v4 }
 0x2fb   :  { %v1957_v23 = vpop.f32.mrf.mxu1 }
 0x2fc   :  { %2242 = vtanh.f32 %v1697_v22 }
 0x309   :  { %v2243_v24 = vpop.eup %2242 }
 0x30a   :  { %v1703_v25 = vmul.f32 2.0, %v2243_v24 }
 0x30c   :  { %1704 = vst [vmem:[#allocation11] sm:$0xff] %v1703_v25 }
 0x30d   :  { %2355 = shalt.err (!%p2352_p1)
}
 0x30e   :  { %1714 = dma.vmem_to_hbm [thread:$0]  %s1712_s29, 128, %s2484_s7, [#allocation4]  }
 0x30f   :  { %2370 = dma.done.wait [#allocation4], 128  }
 0x310   :  { %2371 = vsyncadd [#allocation4], 4294967168 }
 0x311   :  { %1718 = vsyncpa [#allocation3], 1 }
 0x312   :  { %1719 = vsyncpa [#allocation6], 1 }
 0x313   :  { %1720 = vsyncpa [#allocation9], 1 }
 0x314   :  { %1721 = vsyncpa [#allocation4], 1 }

</bundles_post_ra>
